<compile_context>
chip_gen: v7x
topology: tpu7x:2x2x1
jax: 0.10.0
libtpu: 0.0.40
codegen_flags: <defaults>
</compile_context>

<pallas_src>
import functools

import jax
import jax.numpy as jnp
from jax.experimental import pallas as pl
from jax.experimental.pallas import tpu as pltpu

_K = 8.0     # Aliev-Panfilov k
_E = 0.01    # Aliev-Panfilov epsilon


def _make_kernel(D, block_b, total_b):
    """Build the AP RHS kernel for a given (static) D / batch-tile geometry."""
    needs_mask = (total_b % block_b) != 0

    def kernel(y_ref, s_ref, par_ref, out_ref, vmin_ref, vmax_ref):
        par = par_ref[0]                     # scalar from SMEM
        u = y_ref[:, :D]                     # (TB, D)  lane-aligned for D % 128 == 0
        v = y_ref[:, D:]                     # (TB, D)

        # MK.T = U @ S.T  == (S @ U.T).T ; contract u dim-1 with S dim-1
        # (MXU trans_b) so S never needs a transpose in HBM or VMEM.
        mk = jax.lax.dot_general(
            u, s_ref[...],
            dimension_numbers=(((1,), (1,)), ((), ())),
            preferred_element_type=jnp.float32)

        ku = _K * u
        upar = u - par
        val = u * v
        out_ref[:, :D] = mk + ku * (1.0 - u) * upar - val
        out_ref[:, D:] = (-_E) * (ku * (upar - 1.0) + v)

        # Per-tile partial min/max of val (side-effect tracking in the torch
        # module).  If the last tile is padded, mask out the garbage rows.
        if needs_mask:
            row = jax.lax.broadcasted_iota(jnp.int32, val.shape, 0)
            valid = (pl.program_id(0) * block_b + row) < total_b
            vmin_t = jnp.min(jnp.where(valid, val, jnp.inf))
            vmax_t = jnp.max(jnp.where(valid, val, -jnp.inf))
        else:
            vmin_t = jnp.min(val)
            vmax_t = jnp.max(val)
        vmin_ref[...] = jnp.full(vmin_ref.shape, vmin_t, dtype=vmin_ref.dtype)
        vmax_ref[...] = jnp.full(vmax_ref.shape, vmax_t, dtype=vmax_ref.dtype)

    return kernel


@functools.partial(jax.jit, static_argnames=("block_b",))
def ap_forward(t, y, S, par, *, block_b=None):
    """Pallas equivalent of APModel.forward. `t` is unused (ODE-solver API)."""
    del t
    B, twoD = y.shape
    D = twoD // 2
    assert S.shape == (D, D)

    # Batch tile: whole batch when small (block == full dim is always legal),
    # otherwise 512-row tiles (multiple of the f32 sublane) over a 1-D grid.
    if block_b is None:
        block_b = B if B <= 512 else 512
    grid_b = pl.cdiv(B, block_b)

    y = y.astype(jnp.float32)
    s = S.astype(jnp.float32)
    par_arr = jnp.asarray([par], dtype=jnp.float32)      # scalar -> SMEM

    kernel = _make_kernel(D, block_b, B)

    out, vmin_part, vmax_part = pl.pallas_call(
        kernel,
        out_shape=(
            jax.ShapeDtypeStruct((B, 2 * D), jnp.float32),
            jax.ShapeDtypeStruct((grid_b * 8, 128), jnp.float32),
            jax.ShapeDtypeStruct((grid_b * 8, 128), jnp.float32),
        ),
        grid_spec=pltpu.PrefetchScalarGridSpec(
            num_scalar_prefetch=0,
            grid=(grid_b,),
            in_specs=[
                pl.BlockSpec((block_b, 2 * D), lambda i: (i, 0)),    # y tile
                pl.BlockSpec((D, D), lambda i: (0, 0)),              # S (resident)
                pl.BlockSpec(memory_space=pltpu.MemorySpace.SMEM),   # par scalar
            ],
            out_specs=(
                pl.BlockSpec((block_b, 2 * D), lambda i: (i, 0)),    # out tile
                pl.BlockSpec((8, 128), lambda i: (i, 0)),            # tile min
                pl.BlockSpec((8, 128), lambda i: (i, 0)),            # tile max
            ),
        ),
        compiler_params=pltpu.CompilerParams(
            dimension_semantics=("parallel",),      # megacore split over batch
            vmem_limit_bytes=32 * 1024 * 1024,      # safe on v5e/v6e/v7x
        ),
        cost_estimate=pl.CostEstimate(
            flops=2 * B * D * D + 10 * B * 2 * D,
            transcendentals=0,
            bytes_accessed=4 * (2 * B * 2 * D + D * D + 1),
        ),
    )(y, s, par_arr)

    # Tiny cross-tile combine of per-tile partial reductions (race-free even
    # with the "parallel" megacore split).
    return out, jnp.min(vmin_part), jnp.max(vmax_part)


def ap_forward_ref(t, y, S, par):
    """Pure-JAX reference mirroring the torch code exactly."""
    del t
    D = y.shape[1] // 2
    k, e = 8.0, 0.01
    u = y[:, :D].T
    v = y[:, D:].T
    MK = S @ u
    val = u * v
    pde1 = MK + k * u * (1.0 - u) * (u - par) - u * v
    pde2 = -e * (k * u * (u - par - 1.0) + v)
    out = jnp.concatenate((pde1, pde2), axis=0).T
    return out, jnp.min(val), jnp.max(val)


if __name__ == "__main__":
    batch_size = 8
    dimD = 128
    par = 0.15  # deterministic scalar parameter (Aliev-Panfilov 'a')

    key = jax.random.PRNGKey(0)
    k1, k2 = jax.random.split(key)
    # Deterministic synthetic "stiffness"/Laplacian-like matrix S and state y.
    S = (jax.random.normal(k1, (dimD, dimD), dtype=jnp.float32) * 0.05
         - 0.1 * jnp.eye(dimD, dtype=jnp.float32))
    y = jax.random.uniform(k2, (batch_size, 2 * dimD), dtype=jnp.float32)
    t = jnp.float32(0.0)

    out, vmin, vmax = ap_forward(t, y, S, par)
    jax.block_until_ready(out)

    out_ref, vmin_ref, vmax_ref = ap_forward_ref(t, y, S, par)
    assert jnp.allclose(out, out_ref, atol=1e-4, rtol=1e-4)
    assert jnp.allclose(vmin, vmin_ref, atol=1e-5)
    assert jnp.allclose(vmax, vmax_ref, atol=1e-5)

    print("KERNEL_OK")
</pallas_src>

<mosaic_0001>
module attributes {stable_mosaic.version = 11 : i64} {
  func.func @kernel(%arg0: i32, %arg1: memref<8x256xf32, #tpu.memory_space<vmem>>, %arg2: memref<128x128xf32, #tpu.memory_space<vmem>>, %arg3: memref<1xf32, #tpu.memory_space<smem>>, %arg4: memref<8x256xf32, #tpu.memory_space<vmem>>, %arg5: memref<8x128xf32, #tpu.memory_space<vmem>>, %arg6: memref<8x128xf32, #tpu.memory_space<vmem>>) attributes {dimension_semantics = [#tpu.dimension_semantics<parallel>], iteration_bounds = array<i64: 1>, scalar_prefetch = 0 : i64, scratch_operands = 0 : i64, tpu.core_type = #tpu.core_type<tc>, window_params = [{transform_indices = @transform_0, window_bounds = array<i64: 8, 256>}, {pipeline_mode = #tpu.pipeline_mode<synchronous>, transform_indices = @transform_1, window_bounds = array<i64: 128, 128>}, {transform_indices = @transform_2, window_bounds = array<i64: 1>}, {transform_indices = @transform_3, window_bounds = array<i64: 8, 256>}, {transform_indices = @transform_4, window_bounds = array<i64: 8, 128>}, {transform_indices = @transform_5, window_bounds = array<i64: 8, 128>}]} {
    %c0 = arith.constant 0 : index
    %0 = memref.load %arg3[%c0] : memref<1xf32, #tpu.memory_space<smem>>
    %c0_0 = arith.constant 0 : index
    %c0_1 = arith.constant 0 : index
    %1 = vector.load %arg1[%c0_0, %c0_1] : memref<8x256xf32, #tpu.memory_space<vmem>>, vector<8x128xf32>
    %c0_2 = arith.constant 0 : index
    %c128 = arith.constant 128 : index
    %2 = vector.load %arg1[%c0_2, %c128] : memref<8x256xf32, #tpu.memory_space<vmem>>, vector<8x128xf32>
    %c0_3 = arith.constant 0 : index
    %c0_4 = arith.constant 0 : index
    %3 = vector.load %arg2[%c0_3, %c0_4] : memref<128x128xf32, #tpu.memory_space<vmem>>, vector<128x128xf32>
    %cst = arith.constant dense<0.000000e+00> : vector<8x128xf32>
    %4 = tpu.matmul %1, %3, %cst {dimension_numbers = #tpu.dot_dimension_numbers<[1], [1], [0], [0], [0, 0, 1, 0], [], []>} : vector<8x128xf32>, vector<128x128xf32>, vector<8x128xf32> -> vector<8x128xf32>
    %cst_5 = arith.constant 8.000000e+00 : f32
    %5 = vector.broadcast %cst_5 : f32 to vector<8x128xf32>
    %6 = arith.mulf %5, %1 : vector<8x128xf32>
    %7 = vector.broadcast %0 : f32 to vector<8x128xf32>
    %8 = arith.subf %1, %7 : vector<8x128xf32>
    %9 = arith.mulf %1, %2 : vector<8x128xf32>
    %cst_6 = arith.constant 1.000000e+00 : f32
    %10 = vector.broadcast %cst_6 : f32 to vector<8x128xf32>
    %11 = arith.subf %10, %1 : vector<8x128xf32>
    %12 = arith.mulf %6, %11 : vector<8x128xf32>
    %13 = arith.mulf %12, %8 : vector<8x128xf32>
    %14 = arith.addf %4, %13 : vector<8x128xf32>
    %15 = arith.subf %14, %9 : vector<8x128xf32>
    %c0_7 = arith.constant 0 : index
    %c0_8 = arith.constant 0 : index
    %16 = vector.load %arg4[%c0_7, %c0_8] : memref<8x256xf32, #tpu.memory_space<vmem>>, vector<8x128xf32>
    tpu.vector_store %arg4[%c0_7, %c0_8], %15 {strides = array<i32>} : memref<8x256xf32, #tpu.memory_space<vmem>>, vector<8x128xf32>,
    %cst_9 = arith.constant 1.000000e+00 : f32
    %17 = vector.broadcast %cst_9 : f32 to vector<8x128xf32>
    %18 = arith.subf %8, %17 : vector<8x128xf32>
    %19 = arith.mulf %6, %18 : vector<8x128xf32>
    %20 = arith.addf %19, %2 : vector<8x128xf32>
    %cst_10 = arith.constant -0.00999999977 : f32
    %21 = vector.broadcast %cst_10 : f32 to vector<8x128xf32>
    %22 = arith.mulf %21, %20 : vector<8x128xf32>
    %c0_11 = arith.constant 0 : index
    %c128_12 = arith.constant 128 : index
    %23 = vector.load %arg4[%c0_11, %c128_12] : memref<8x256xf32, #tpu.memory_space<vmem>>, vector<8x128xf32>
    tpu.vector_store %arg4[%c0_11, %c128_12], %22 {strides = array<i32>} : memref<8x256xf32, #tpu.memory_space<vmem>>, vector<8x128xf32>,
    %24 = vector.shape_cast %9 : vector<8x128xf32> to vector<1x8x128xf32>
    %cst_13 = arith.constant dense<0x7F800000> : vector<1xf32>
    %25 = vector.multi_reduction <minimumf>, %24, %cst_13 [1, 2] : vector<1x8x128xf32> to vector<1xf32>
    %26 = vector.shape_cast %25 : vector<1xf32> to vector<1x1x1xf32>
    %27 = vector.extract %26[0, 0, 0] : f32 from vector<1x1x1xf32>
    %28 = vector.shape_cast %9 : vector<8x128xf32> to vector<1x8x128xf32>
    %cst_14 = arith.constant dense<0xFF800000> : vector<1xf32>
    %29 = vector.multi_reduction <maximumf>, %28, %cst_14 [1, 2] : vector<1x8x128xf32> to vector<1xf32>
    %30 = vector.shape_cast %29 : vector<1xf32> to vector<1x1x1xf32>
    %31 = vector.extract %30[0, 0, 0] : f32 from vector<1x1x1xf32>
    %32 = vector.broadcast %27 : f32 to vector<8x128xf32>
    %c0_15 = arith.constant 0 : index
    %c0_16 = arith.constant 0 : index
    %33 = vector.load %arg5[%c0_15, %c0_16] : memref<8x128xf32, #tpu.memory_space<vmem>>, vector<8x128xf32>
    tpu.vector_store %arg5[%c0_15, %c0_16], %32 {strides = array<i32>} : memref<8x128xf32, #tpu.memory_space<vmem>>, vector<8x128xf32>,
    %34 = vector.broadcast %31 : f32 to vector<8x128xf32>
    %c0_17 = arith.constant 0 : index
    %c0_18 = arith.constant 0 : index
    %35 = vector.load %arg6[%c0_17, %c0_18] : memref<8x128xf32, #tpu.memory_space<vmem>>, vector<8x128xf32>
    tpu.vector_store %arg6[%c0_17, %c0_18], %34 {strides = array<i32>} : memref<8x128xf32, #tpu.memory_space<vmem>>, vector<8x128xf32>,
    return
  }
  func.func @transform_0(%arg0: i32) -> (i32, i32) {
    %c0_i32 = arith.constant 0 : i32
    %c0_i32_0 = arith.constant 0 : i32
    return %arg0, %c0_i32 : i32, i32
  }
  func.func @transform_1(%arg0: i32) -> (i32, i32) {
    %c0_i32 = arith.constant 0 : i32
    %c0_i32_0 = arith.constant 0 : i32
    %c0_i32_1 = arith.constant 0 : i32
    return %c0_i32, %c0_i32_0 : i32, i32
  }
  func.func @transform_2(%arg0: i32) -> i32 {
    %c0_i32 = arith.constant 0 : i32
    %c0_i32_0 = arith.constant 0 : i32
    return %c0_i32 : i32
  }
  func.func @transform_3(%arg0: i32) -> (i32, i32) {
    %c0_i32 = arith.constant 0 : i32
    %c0_i32_0 = arith.constant 0 : i32
    return %arg0, %c0_i32 : i32, i32
  }
  func.func @transform_4(%arg0: i32) -> (i32, i32) {
    %c0_i32 = arith.constant 0 : i32
    %c0_i32_0 = arith.constant 0 : i32
    return %arg0, %c0_i32 : i32, i32
  }
  func.func @transform_5(%arg0: i32) -> (i32, i32) {
    %c0_i32 = arith.constant 0 : i32
    %c0_i32_0 = arith.constant 0 : i32
    return %arg0, %c0_i32 : i32, i32
  }
}

</mosaic_0001>

<bundles_post_ra>
// kernel: ap_forward.1
= control target key start
LH: loop header
LB: loop body
LE: loop exit
PB: predicated region body
PF: predicated region fallthrough
CT: control target
= control target key end

     0   :  { %12 = vsyncpa [#allocation4], 0  ;;  %s450_s0 = inlined_call_operand.hbm [shape: f32[8,256], index: 0, kind: input, shape index: {}]   ;;  %s451_s1 = inlined_call_operand.hbm [shape: f32[128,128], index: 1, kind: input, shape index: {}]   ;;  %s452_s2 = inlined_call_operand.<no memory space> [shape: f32[1], index: 2, kind: input, shape index: {}]   ;;  %s453_s3 = inlined_call_operand.hbm [shape: f32[8,256], index: 3, kind: output, shape index: {0}]   ;;  %s454_s4 = inlined_call_operand.vmem [shape: f32[8,128], index: 4, kind: output, shape index: {1}]   ;;  %s455_s5 = inlined_call_operand.vmem [shape: f32[8,128], index: 5, kind: output, shape index: {2}]  }
   0x1   :  { %13 = vsyncpa [#allocation7], 0 }
   0x2   :  { %14 = vsyncpa [#allocation5], 0  ;;  %s355_s18 = smov [#allocation3]   ;;  %s356_s20 = smov [#allocation6]  }
   0x3   :  { %s21_s19 = sshll.u32 %s355_s18, 4  ;;  %s30_s21 = sshll.u32 %s356_s20, 4  ;;  %s22_s19 = int_to_ptr.vmem [resolvable:$true] %s21_s19  ;;  %s393_s21 = int_to_ptr.vmem [resolvable:$true] %s30_s21 }
   0x4   :  { %s283_s24 = scalar_lea.hbm %s450_s0, 256 }
   0x5   :  { %p284_p0 = scmp.ne.s32.totalorder %s450_s0, %s283_s24  ;;  %p287_p1 = scmp.lt.u32.totalorder %s283_s24, %s450_s0 }
   0x7   :  { %p289_p2 = pnand %p287_p1, %p284_p0 }
   0x9   :  { %292 = shalt.err (!%p289_p2)
}
   0xa   :  { %s293_s29 = scalar_lea.vmem %s22_s19, 256  ;;  %p298_p4 = scmp.lt.s32.totalorder %s22_s19, %s22_s19 }
   0xb   :  { %p294_p3 = scmp.ne.s32.totalorder %s22_s19, %s293_s29  ;;  %p299_p5 = scmp.lt.s32.totalorder %s293_s29, %s293_s29 }
   0xd   :  { %p300_p6 = por %p299_p5, %p298_p4 }
   0xf   :  { %p301_p7 = pnand %p300_p6, %p294_p3 }
  0x11   :  { %304 = shalt.err (!%p301_p7)
}
  0x12   :  { %24 = dma.hbm_to_vmem [thread:$0]  %s450_s0, 256, %s22_s19, [#allocation4]  }
  0x13   :  { %s305_s9 = scalar_lea.hbm %s451_s1, 2048 }
  0x14   :  { %p306_p8 = scmp.ne.s32.totalorder %s451_s1, %s305_s9  ;;  %p309_p9 = scmp.lt.u32.totalorder %s305_s9, %s451_s1 }
  0x16   :  { %p311_p10 = pnand %p309_p9, %p306_p8 }
  0x18   :  { %314 = shalt.err (!%p311_p10)
}
  0x19   :  { %s315_s14 = scalar_lea.vmem %s393_s21, 2048  ;;  %p320_p12 = scmp.lt.s32.totalorder %s393_s21, %s393_s21 }
  0x1a   :  { %p316_p11 = scmp.ne.s32.totalorder %s393_s21, %s315_s14  ;;  %p321_p13 = scmp.lt.s32.totalorder %s315_s14, %s315_s14 }
  0x1c   :  { %p322_p0 = por %p321_p13, %p320_p12 }
  0x1e   :  { %p323_p1 = pnand %p322_p0, %p316_p11 }
  0x20   :  { %326 = shalt.err (!%p323_p1)
}
  0x21   :  { %s357_s0 = smov 128   ;;  %s358_s15 = smov 8  }
  0x22   :  { %36 = dma.hbm_to_vmem [thread:$0]  %s451_s1, 2048, %s393_s21, [#allocation7], %s357_s0, %s357_s0, %s358_s15  }
  0x23   :  { %349 = dma.done.wait [#allocation4], 256  }
  0x24   :  { %350 = vsyncadd [#allocation4], 4294967040 }
  0x25   :  { %351 = dma.done.wait [#allocation7], 2048  }
  0x26   :  { %352 = vsyncadd [#allocation7], 4294965248  ;;  %v359_v0 = vmov 0.0|0.0   ;;  %vm360_vm0 = vmmov 0   ;;  %v361_v1 = vmov 0.0   ;;  %v48_v2 = vld [vmem:[#allocation6] sm:$0xff]  ;;  %v65_v30 = vstv %s452_s2 }
  0x27   :  { %247 = vmatprep.subr.bf16.mxu0 %v359_v0  ;;  %244 = vmatprep.mubr.msk.f32.mxu0 %vm360_vm0, %v361_v1  ;;  %v49_v3 = vld [vmem:[#allocation6 + $0x8] sm:$0xff]  ;;  %v50_v5 = vld [vmem:[#allocation6 + $0x10] sm:$0xff]  ;;  %v51_v6 = vld [vmem:[#allocation6 + $0x18] sm:$0xff]  ;;  %s362_s24 = smov [#allocation8]  }
  0x28   :  { %v248_v4 = vpack.c.bf16 %v49_v3, %v48_v2  ;;  %v46_v7 = vld [vmem:[#allocation3] sm:$0xff]  ;;  %v47_v8 = vld [vmem:[#allocation3 + $0x8] sm:$0xff]  ;;  %v251_v10 = vpack.c.bf16 %v51_v6, %v50_v5  ;;  %v52_v11 = vld [vmem:[#allocation6 + $0x20] sm:$0xff]  ;;  %s176_s25 = sshll.u32 %s362_s24, 4  ;;  %s177_s25 = int_to_ptr.vmem [resolvable:$true] %s176_s25 }
  0x29   :  { %v424_v9 = vmul.f32 %v47_v8, %v46_v7  ;;  %v53_v12 = vld [vmem:[#allocation6 + $0x28] sm:$0xff]  ;;  %v54_v14 = vld [vmem:[#allocation6 + $0x30] sm:$0xff]  ;;  %v55_v15 = vld [vmem:[#allocation6 + $0x38] sm:$0xff]  ;;  %v64_v29 = vmul.f32 8.0, %v46_v7  ;;  %v68_v31 = vsub.f32 1.0, %v46_v7  ;;  %v66_v32 = vsub.f32 %v46_v7, %v65_v30  ;;  %s327_s26 = scalar_lea.vmem %s177_s25, 256  ;;  %p332_p3 = scmp.lt.s32.totalorder %s177_s25, %s177_s25 }
  0x2a   :  { %249 = vmatpush3.bf16.xpose.msra.mxu0 %v248_v4  ;;  %v254_v13 = vpack.c.bf16 %v53_v12, %v52_v11  ;;  %v257_v16 = vpack.c.bf16 %v55_v15, %v54_v14  ;;  %v56_v17 = vld [vmem:[#allocation6 + $0x40] sm:$0xff]  ;;  %v57_v18 = vld [vmem:[#allocation6 + $0x48] sm:$0xff]  ;;  %v58_v20 = vld [vmem:[#allocation6 + $0x50] sm:$0xff]  ;;  %p328_p2 = scmp.ne.s32.totalorder %s177_s25, %s327_s26  ;;  %p333_p4 = scmp.lt.s32.totalorder %s327_s26, %s327_s26 }
  0x2b   :  { %250 = vmatprep.subr.bf16.mxu0 %v359_v0  ;;  %148 = vmin.xlane.f32.xlu0 %v424_v9  ;;  %v260_v19 = vpack.c.bf16 %v57_v18, %v56_v17  ;;  %v59_v21 = vld [vmem:[#allocation6 + $0x58] sm:$0xff]  ;;  %v60_v23 = vld [vmem:[#allocation6 + $0x60] sm:$0xff]  ;;  %v61_v24 = vld [vmem:[#allocation6 + $0x68] sm:$0xff]  ;;  %v69_v33 = vmul.f32 %v68_v31, %v64_v29  ;;  %v194_v35 = vadd.f32 -1.0, %v66_v32 }
  0x2c   :  { %v263_v22 = vpack.c.bf16 %v59_v21, %v58_v20  ;;  %v266_v25 = vpack.c.bf16 %v61_v24, %v60_v23  ;;  %v62_v26 = vld [vmem:[#allocation6 + $0x70] sm:$0xff]  ;;  %v63_v27 = vld [vmem:[#allocation6 + $0x78] sm:$0xff]  ;;  %p334_p5 = por %p333_p4, %p332_p3 }
  0x2d   :  { %v269_v28 = vpack.c.bf16 %v63_v27, %v62_v26  ;;  %v70_v34 = vmul.f32 %v69_v33, %v66_v32  ;;  %v144_v36 = vmul.f32 %v194_v35, %v64_v29 }
  0x2e   :  { %p335_p6 = pnand %p334_p5, %p328_p2 }
  0x2f   :  { %157 = vmax.xlane.f32.xlu0 %v424_v9  ;;  %v145_v39 = vadd.f32 %v144_v36, %v47_v8 }
  0x31   :  { %v146_v41 = vmul.f32 -0.01, %v145_v39 }
  0x32   :  { %252 = vmatpush3.bf16.xpose.msra.mxu0 %v251_v10 }
  0x33   :  { %253 = vmatprep.subr.bf16.mxu0 %v359_v0  ;;  %147 = vst [vmem:[#allocation8 + $0x8] sm:$0xff] %v146_v41 }
  0x3a   :  { %255 = vmatpush3.bf16.xpose.msra.mxu0 %v254_v13 }
  0x3b   :  { %256 = vmatprep.subr.bf16.mxu0 %v359_v0 }
  0x42   :  { %258 = vmatpush3.bf16.xpose.msra.mxu0 %v257_v16 }
  0x43   :  { %259 = vmatprep.subr.bf16.mxu0 %v359_v0 }
  0x4a   :  { %261 = vmatpush3.bf16.xpose.msra.mxu0 %v260_v19 }
  0x4b   :  { %262 = vmatprep.subr.bf16.mxu0 %v359_v0 }
  0x52   :  { %264 = vmatpush3.bf16.xpose.msra.mxu0 %v263_v22 }
  0x53   :  { %265 = vmatprep.subr.bf16.mxu0 %v359_v0 }
  0x5a   :  { %267 = vmatpush3.bf16.xpose.msra.mxu0 %v266_v25 }
  0x5b   :  { %268 = vmatprep.subr.bf16.mxu0 %v359_v0 }
  0x62   :  { %270 = vmatpush3.bf16.xpose.msra.mxu0 %v269_v28 }
  0x69   :  { %245 = vmatmul.mubr.f32.vlgmr.msra.gmra.mrb[0].mxu0 %v46_v7 }
  0xb8   :  { %v149_v37 = vpop.xlane.xlu0 %148 }
  0xb9   :  { %v150_v38 = vrot.slane %v149_v37, 4 }
  0xbb   :  { %v151_v40 = vmin.f32 %v149_v37, %v150_v38 }
  0xbc   :  { %v158_v42 = vpop.xlane.xlu0 %157 }
  0xbd   :  { %v152_v43 = vrot.slane %v151_v40, 2  ;;  %v159_v44 = vrot.slane %v158_v42, 4 }
  0xbf   :  { %v160_v45 = vmax.f32 %v158_v42, %v159_v44  ;;  %v153_v46 = vmin.f32 %v151_v40, %v152_v43 }
  0xc1   :  { %v161_v47 = vrot.slane %v160_v45, 2  ;;  %v154_v48 = vrot.slane %v153_v46, 1 }
  0xc3   :  { %v162_v49 = vmax.f32 %v160_v45, %v161_v47  ;;  %v155_v50 = vmin.f32 %v153_v46, %v154_v48 }
  0xc5   :  { %271 = vpush %v155_v50  ;;  %v163_v51 = vrot.slane %v162_v49, 1 }
  0xc7   :  { %v164_v52 = vmax.f32 %v162_v49, %v163_v51 }
  0xc9   :  { %273 = vpush %v164_v52 }
  0xf6   :  { %s272_s2 = spop %271 }
  0xf7   :  { %v166_v53 = vstv %s272_s2 }
  0xf8   :  { %167 = vst [vmem:[%s454_s4] sm:$0xff] %v166_v53 }
  0xfa   :  { %s274_s21 = spop %273 }
  0xfb   :  { %v168_v54 = vstv %s274_s21 }
  0xfc   :  { %169 = vst [vmem:[%s455_s5] sm:$0xff] %v168_v54 }
 0x13c   :  { %v137_v55 = vpop.f32.mrb[0].mxu0 }
 0x13d   :  { %v138_v56 = vadd.f32 %v137_v55, %v70_v34  ;;  %v246_v57 = vpop.f32.mrb[1].mxu0 }
 0x13f   :  { %v141_v58 = vsub.f32 %v138_v56, %v424_v9 }
 0x141   :  { %142 = vst [vmem:[#allocation8] sm:$0xff] %v141_v58 }
 0x142   :  { %338 = shalt.err (!%p335_p6)
}
 0x143   :  { %s339_s5 = scalar_lea.hbm %s453_s3, 256 }
 0x144   :  { %p340_p7 = scmp.ne.s32.totalorder %s453_s3, %s339_s5  ;;  %p343_p8 = scmp.lt.u32.totalorder %s339_s5, %s453_s3 }
 0x146   :  { %p345_p9 = pnand %p343_p8, %p340_p7 }
 0x148   :  { %348 = shalt.err (!%p345_p9)
}
 0x149   :  { %179 = dma.vmem_to_hbm [thread:$0]  %s177_s25, 256, %s453_s3, [#allocation5]  }
 0x14a   :  { %353 = dma.done.wait [#allocation5], 256  }
 0x14b   :  { %354 = vsyncadd [#allocation5], 4294967040 }
 0x14c   :  { %191 = vsyncpa [#allocation4], 1 }
 0x14d   :  { %192 = vsyncpa [#allocation7], 1 }
 0x14e   :  { %193 = vsyncpa [#allocation5], 1 }

</bundles_post_ra>
